<compile_context>
chip_gen: v7x
topology: tpu7x:2x2x1
jax: 0.10.0
libtpu: 0.0.40
codegen_flags: <defaults>
</compile_context>

<pallas_src>
import jax
import jax.numpy as jnp
from jax.experimental import pallas as pl
from jax.experimental.pallas import tpu as pltpu


def _round_up(x, m):
    return ((x + m - 1) // m) * m


def _make_emb_kernel(vk: int, n_chunks: int):
    """Kernel for one tile of T tokens.

    idx_ref:   VMEM (1, T)    int32   token ids (lane-dense)
    table_ref: VMEM (Vp, Dp)  float32 full padded embedding table (resident)
    emb_ref:   VMEM (T, Dp)   float32 output embeddings (dense tile)
    mask_ref:  VMEM (1, T)    float32 output mask = (tok > 0) (lane-dense)
    """

    def kernel(idx_ref, table_ref, emb_ref, mask_ref):
        tok = idx_ref[...]                                   # (1, T) int32
        t = emb_ref.shape[0]

        # mask = (string_lkup > 0).float(): lane-dense VPU compare + store.
        mask_ref[...] = (tok > 0).astype(jnp.float32)

        def chunk_dot(c):
            # One-hot for vocab ids [c*vk, (c+1)*vk): shape (vk, T).
            start = c * vk
            if not isinstance(start, int):
                start = pl.multiple_of(start, vk)
            vocab_ids = jax.lax.broadcasted_iota(jnp.int32, (vk, t), 0) + start
            one_hot = (vocab_ids == tok).astype(table_ref.dtype)      # (vk, T)
            tbl = table_ref[pl.ds(start, vk), :] if n_chunks > 1 else table_ref[...]
            # one_hot^T @ tbl -> (T, Dp) on the MXU (TN dimension numbers,
            # same pattern as the official flash-attention backward kernels).
            return jax.lax.dot_general(
                one_hot, tbl,
                dimension_numbers=(((0,), (0,)), ((), ())),
                preferred_element_type=jnp.float32)

        if n_chunks == 1:
            emb_ref[...] = chunk_dot(0).astype(emb_ref.dtype)
        else:
            emb_ref[...] = jnp.zeros(emb_ref.shape, emb_ref.dtype)
            if n_chunks <= 8:
                for c in range(n_chunks):                     # static unroll
                    emb_ref[...] += chunk_dot(c).astype(emb_ref.dtype)
            else:
                def body(c, carry):
                    emb_ref[...] += chunk_dot(c).astype(emb_ref.dtype)
                    return carry
                jax.lax.fori_loop(0, n_chunks, body, 0)

    return kernel


def pad_embedding_table(weight):
    """One-time (parameter-init-time) padding of the nn.Embedding weight.

    Returns (padded_table [Vp, Dp], (V, D, VK)). Padding is hoisted out of the
    per-call path so the forward pass does not re-copy the table every step.
    """
    V, D = weight.shape
    # Vocab-chunk size for the one-hot contraction: <= 512 rows per MXU pass,
    # 256-aligned for the 2x256x256 MXUs on v6e/v7x (128 would also be fine on
    # v5e's 4x128x128 MXU).
    VK = 512 if V > 512 else _round_up(max(V, 1), 256)
    Vp = _round_up(V, VK)
    Dp = _round_up(D, 128)
    if (Vp, Dp) == (V, D):
        table = weight
    else:
        table = jnp.zeros((Vp, Dp), weight.dtype).at[:V, :D].set(weight)
    # TODO(synk): optionally store the table in bf16 (one-hot selection stays
    # exact) to halve resident VMEM when bit-exact f32 parity is not required.
    return table, (V, D, VK)


def _make_table_spec(vp, dp, single_buffer):
    index_map = lambda i: (0, 0)
    if single_buffer:
        try:
            # Constant index_map -> block fetched once; one buffer is enough.
            return pl.BlockSpec((vp, dp), index_map, pipeline_mode=pl.Buffered(1))
        except Exception:
            return None
    return pl.BlockSpec((vp, dp), index_map)


def emb_forward(string_lkup, table, table_meta, *, token_tile=512):
    """string_lkup: int [B, S]; (table, table_meta) from pad_embedding_table.

    Returns (emb [B, S, D] in the weight dtype, mask [B, S] float32)."""
    V, D, VK = table_meta
    Vp, Dp = table.shape
    n_chunks = Vp // VK

    B, S = string_lkup.shape
    N = B * S

    # Token tile: multiple of 128, at most token_tile, no bigger than needed.
    T = _round_up(min(max(int(token_tile), 1), max(N, 1)), 128)
    Np = _round_up(N, T)
    num_tiles = Np // T

    # Lane-dense token ids (num_tiles, T); padded tokens are 0 (-> zero row).
    flat = string_lkup.reshape(N).astype(jnp.int32)
    if Np != N:
        flat = jnp.zeros((Np,), jnp.int32).at[:N].set(flat)
    idx = flat.reshape(num_tiles, T)

    # ---- VMEM budget / per-generation limit --------------------------------
    table_bytes = Vp * Dp * 4
    vmem_need = (2 * table_bytes              # table (worst case: 2 buffers)
                 + 2 * T * Dp * 4             # emb output tiles (double-buffered)
                 + 2 * 2 * 8 * T * 4          # idx in + mask out (sublane-padded)
                 + 2 * VK * T * 4             # one-hot + iota temporaries
                 + (2 << 20))                 # slack
    try:
        vmem_cap = int(getattr(pltpu.get_tpu_info(), "vmem_capacity_bytes",
                               64 << 20))
    except Exception:
        vmem_cap = 64 << 20                   # safe on every current generation
    vmem_limit = int(min(max(vmem_need, 32 << 20), vmem_cap - (8 << 20)))
    # TODO(synk): tables larger than the per-core VMEM budget need a D-blocked
    # (outer grid axis over Dp slabs) or HBM-gather path; the resident-table
    # path assumes Vp*Dp*4 fits in one TensorCore's VMEM.

    compiler_params = pltpu.CompilerParams(
        dimension_semantics=("parallel",),    # independent token tiles
        vmem_limit_bytes=vmem_limit,
    )

    kernel = _make_emb_kernel(VK, n_chunks)
    out_shape = (
        jax.ShapeDtypeStruct((Np, Dp), table.dtype),
        jax.ShapeDtypeStruct((num_tiles, T), jnp.float32),
    )

    def run(table_spec):
        grid_spec = pltpu.PrefetchScalarGridSpec(
            num_scalar_prefetch=0,
            grid=(num_tiles,),
            in_specs=[
                pl.BlockSpec((1, T), lambda i: (i, 0)),    # token ids, lane-dense
                table_spec,                                # VMEM-resident table
            ],
            out_specs=[
                pl.BlockSpec((T, Dp), lambda i: (i, 0)),   # dense (T, Dp) tiles
                pl.BlockSpec((1, T), lambda i: (i, 0)),    # lane-dense mask tile
            ],
        )
        return pl.pallas_call(
            kernel,
            out_shape=out_shape,
            grid_spec=grid_spec,
            compiler_params=compiler_params,
        )(idx, table)

    single_spec = _make_table_spec(Vp, Dp, single_buffer=True)
    if single_spec is not None:
        try:
            emb_p, mask_p = run(single_spec)
        except Exception:
            # pipeline_mode not supported by this lowering: fall back to the
            # default double-buffered (still correct) table spec.
            emb_p, mask_p = run(_make_table_spec(Vp, Dp, single_buffer=False))
    else:
        emb_p, mask_p = run(_make_table_spec(Vp, Dp, single_buffer=False))

    emb = emb_p[:N, :D].reshape(B, S, D)
    mask = mask_p.reshape(Np)[:N].reshape(B, S)
    return emb, mask


if __name__ == "__main__":
    # Deterministic parameter / input construction (no checkpoint loading).
    vocab_size, embedding_dim = 32, 128
    B, S = 2, 8

    key = jax.random.PRNGKey(0)
    k_w, k_idx = jax.random.split(key)

    # nn.Embedding default init ~ N(0, 1); padding_idx=0 => row 0 is zero.
    weight = jax.random.normal(k_w, (vocab_size, embedding_dim), dtype=jnp.float32)
    weight = weight.at[0].set(0.0)

    # Token ids, including some zeros (padding).
    string_lkup = jax.random.randint(k_idx, (B, S), 0, vocab_size, dtype=jnp.int32)
    string_lkup = string_lkup.at[0, 0].set(0).at[1, 3].set(0)

    # One-time table padding (hoisted out of the per-call path).
    table, table_meta = pad_embedding_table(weight)

    emb, mask = emb_forward(string_lkup, table, table_meta)
    emb = jax.block_until_ready(emb)
    mask = jax.block_until_ready(mask)

    # Reference check (plain JAX)
    ref_emb = weight[string_lkup]
    ref_mask = (string_lkup > 0).astype(jnp.float32)
    assert emb.shape == (B, S, embedding_dim) and mask.shape == (B, S)
    assert jnp.allclose(emb, ref_emb, rtol=1e-5, atol=1e-5), "embedding mismatch"
    assert jnp.allclose(mask, ref_mask), "mask mismatch"

    print("KERNEL_OK")
</pallas_src>

<mosaic_0001>
module attributes {stable_mosaic.version = 11 : i64} {
  func.func @kernel(%arg0: i32, %arg1: memref<1x128xi32, #tpu.memory_space<vmem>>, %arg2: memref<256x128xf32, #tpu.memory_space<vmem>>, %arg3: memref<128x128xf32, #tpu.memory_space<vmem>>, %arg4: memref<1x128xf32, #tpu.memory_space<vmem>>) attributes {dimension_semantics = [#tpu.dimension_semantics<parallel>], iteration_bounds = array<i64: 1>, scalar_prefetch = 0 : i64, scratch_operands = 0 : i64, tpu.core_type = #tpu.core_type<tc>, window_params = [{transform_indices = @transform_0, window_bounds = array<i64: 1, 128>}, {pipeline_mode = #tpu.pipeline_mode<synchronous>, transform_indices = @transform_1, window_bounds = array<i64: 256, 128>}, {transform_indices = @transform_2, window_bounds = array<i64: 128, 128>}, {transform_indices = @transform_3, window_bounds = array<i64: 1, 128>}]} {
    %c0 = arith.constant 0 : index
    %c0_0 = arith.constant 0 : index
    %0 = vector.load %arg1[%c0, %c0_0] : memref<1x128xi32, #tpu.memory_space<vmem>>, vector<1x128xi32>
    %c0_i32 = arith.constant 0 : i32
    %1 = vector.broadcast %c0_i32 : i32 to vector<1x128xi32>
    %2 = arith.cmpi sgt, %0, %1 : vector<1x128xi32>
    %3 = arith.extui %2 : vector<1x128xi1> to vector<1x128xi32>
    %4 = arith.sitofp %3 : vector<1x128xi32> to vector<1x128xf32>
    %c0_1 = arith.constant 0 : index
    %c0_2 = arith.constant 0 : index
    %5 = vector.load %arg4[%c0_1, %c0_2] : memref<1x128xf32, #tpu.memory_space<vmem>>, vector<1x128xf32>
    tpu.vector_store %arg4[%c0_1, %c0_2], %4 {strides = array<i32>} : memref<1x128xf32, #tpu.memory_space<vmem>>, vector<1x128xf32>,
    %6 = tpu.iota {dimensions = array<i32: 0>} : vector<256x128xi32>
    %c0_i32_3 = arith.constant 0 : i32
    %7 = vector.broadcast %c0_i32_3 : i32 to vector<256x128xi32>
    %8 = arith.addi %6, %7 : vector<256x128xi32>
    %9 = vector.broadcast %0 : vector<1x128xi32> to vector<256x128xi32>
    %10 = arith.cmpi eq, %8, %9 : vector<256x128xi32>
    %11 = arith.extui %10 : vector<256x128xi1> to vector<256x128xi32>
    %12 = arith.sitofp %11 : vector<256x128xi32> to vector<256x128xf32>
    %c0_4 = arith.constant 0 : index
    %c0_5 = arith.constant 0 : index
    %13 = vector.load %arg2[%c0_4, %c0_5] : memref<256x128xf32, #tpu.memory_space<vmem>>, vector<256x128xf32>
    %cst = arith.constant dense<0.000000e+00> : vector<128x128xf32>
    %14 = tpu.matmul %12, %13, %cst {dimension_numbers = #tpu.dot_dimension_numbers<[0], [0], [1], [1], [0, 1, 1, 1], [], []>} : vector<256x128xf32>, vector<256x128xf32>, vector<128x128xf32> -> vector<128x128xf32>
    %c0_6 = arith.constant 0 : index
    %c0_7 = arith.constant 0 : index
    %15 = vector.load %arg3[%c0_6, %c0_7] : memref<128x128xf32, #tpu.memory_space<vmem>>, vector<128x128xf32>
    tpu.vector_store %arg3[%c0_6, %c0_7], %14 {strides = array<i32>} : memref<128x128xf32, #tpu.memory_space<vmem>>, vector<128x128xf32>,
    return
  }
  func.func @transform_0(%arg0: i32) -> (i32, i32) {
    %c0_i32 = arith.constant 0 : i32
    %c0_i32_0 = arith.constant 0 : i32
    return %arg0, %c0_i32 : i32, i32
  }
  func.func @transform_1(%arg0: i32) -> (i32, i32) {
    %c0_i32 = arith.constant 0 : i32
    %c0_i32_0 = arith.constant 0 : i32
    %c0_i32_1 = arith.constant 0 : i32
    return %c0_i32, %c0_i32_0 : i32, i32
  }
  func.func @transform_2(%arg0: i32) -> (i32, i32) {
    %c0_i32 = arith.constant 0 : i32
    %c0_i32_0 = arith.constant 0 : i32
    return %arg0, %c0_i32 : i32, i32
  }
  func.func @transform_3(%arg0: i32) -> (i32, i32) {
    %c0_i32 = arith.constant 0 : i32
    %c0_i32_0 = arith.constant 0 : i32
    return %arg0, %c0_i32 : i32, i32
  }
}

module attributes {stable_mosaic.version = 11 : i64} {
  func.func @kernel(%arg0: i32, %arg1: memref<1x128xi32, #tpu.memory_space<vmem>>, %arg2: memref<256x128xf32, #tpu.memory_space<vmem>>, %arg3: memref<128x128xf32, #tpu.memory_space<vmem>>, %arg4: memref<1x128xf32, #tpu.memory_space<vmem>>) attributes {dimension_semantics = [#tpu.dimension_semantics<parallel>], iteration_bounds = array<i64: 1>, scalar_prefetch = 0 : i64, scratch_operands = 0 : i64, tpu.core_type = #tpu.core_type<tc>, window_params = [{transform_indices = @transform_0, window_bounds = array<i64: 1, 128>}, {pipeline_mode = #tpu.pipeline_mode<synchronous>, transform_indices = @transform_1, window_bounds = array<i64: 256, 128>}, {transform_indices = @transform_2, window_bounds = array<i64: 128, 128>}, {transform_indices = @transform_3, window_bounds = array<i64: 1, 128>}]} {
    %c0 = arith.constant 0 : index
    %c0_0 = arith.constant 0 : index
    %0 = vector.load %arg1[%c0, %c0_0] : memref<1x128xi32, #tpu.memory_space<vmem>>, vector<1x128xi32>
    %c0_i32 = arith.constant 0 : i32
    %1 = vector.broadcast %c0_i32 : i32 to vector<1x128xi32>
    %2 = arith.cmpi sgt, %0, %1 : vector<1x128xi32>
    %3 = arith.extui %2 : vector<1x128xi1> to vector<1x128xi32>
    %4 = arith.sitofp %3 : vector<1x128xi32> to vector<1x128xf32>
    %c0_1 = arith.constant 0 : index
    %c0_2 = arith.constant 0 : index
    %5 = vector.load %arg4[%c0_1, %c0_2] : memref<1x128xf32, #tpu.memory_space<vmem>>, vector<1x128xf32>
    tpu.vector_store %arg4[%c0_1, %c0_2], %4 {strides = array<i32>} : memref<1x128xf32, #tpu.memory_space<vmem>>, vector<1x128xf32>,
    %6 = tpu.iota {dimensions = array<i32: 0>} : vector<256x128xi32>
    %c0_i32_3 = arith.constant 0 : i32
    %7 = vector.broadcast %c0_i32_3 : i32 to vector<256x128xi32>
    %8 = arith.addi %6, %7 : vector<256x128xi32>
    %9 = vector.broadcast %0 : vector<1x128xi32> to vector<256x128xi32>
    %10 = arith.cmpi eq, %8, %9 : vector<256x128xi32>
    %11 = arith.extui %10 : vector<256x128xi1> to vector<256x128xi32>
    %12 = arith.sitofp %11 : vector<256x128xi32> to vector<256x128xf32>
    %c0_4 = arith.constant 0 : index
    %c0_5 = arith.constant 0 : index
    %13 = vector.load %arg2[%c0_4, %c0_5] : memref<256x128xf32, #tpu.memory_space<vmem>>, vector<256x128xf32>
    %cst = arith.constant dense<0.000000e+00> : vector<128x128xf32>
    %14 = tpu.matmul %12, %13, %cst {dimension_numbers = #tpu.dot_dimension_numbers<[0], [0], [1], [1], [0, 1, 1, 1], [], []>} : vector<256x128xf32>, vector<256x128xf32>, vector<128x128xf32> -> vector<128x128xf32>
    %c0_6 = arith.constant 0 : index
    %c0_7 = arith.constant 0 : index
    %15 = vector.load %arg3[%c0_6, %c0_7] : memref<128x128xf32, #tpu.memory_space<vmem>>, vector<128x128xf32>
    tpu.vector_store %arg3[%c0_6, %c0_7], %14 {strides = array<i32>} : memref<128x128xf32, #tpu.memory_space<vmem>>, vector<128x128xf32>,
    return
  }
  func.func @transform_0(%arg0: i32) -> (i32, i32) {
    %c0_i32 = arith.constant 0 : i32
    %c0_i32_0 = arith.constant 0 : i32
    return %arg0, %c0_i32 : i32, i32
  }
  func.func @transform_1(%arg0: i32) -> (i32, i32) {
    %c0_i32 = arith.constant 0 : i32
    %c0_i32_0 = arith.constant 0 : i32
    %c0_i32_1 = arith.constant 0 : i32
    return %c0_i32, %c0_i32_0 : i32, i32
  }
  func.func @transform_2(%arg0: i32) -> (i32, i32) {
    %c0_i32 = arith.constant 0 : i32
    %c0_i32_0 = arith.constant 0 : i32
    return %arg0, %c0_i32 : i32, i32
  }
  func.func @transform_3(%arg0: i32) -> (i32, i32) {
    %c0_i32 = arith.constant 0 : i32
    %c0_i32_0 = arith.constant 0 : i32
    return %arg0, %c0_i32 : i32, i32
  }
}

</mosaic_0001>

<bundles_post_ra>
// kernel: tpu_custom_call.1
= control target key start
LH: loop header
LB: loop body
LE: loop exit
PB: predicated region body
PF: predicated region fallthrough
CT: control target
= control target key end

     0   :  { %9 = vsyncpa [#allocation3], 0  ;;  %s1038_s0 = inlined_call_operand.hbm [shape: s32[1,128], index: 0, kind: input, shape index: {}]   ;;  %s1039_s1 = inlined_call_operand.hbm [shape: f32[256,128], index: 1, kind: input, shape index: {}]   ;;  %s1040_s2 = inlined_call_operand.hbm [shape: f32[128,128], index: 2, kind: output, shape index: {0}]   ;;  %s1041_s3 = inlined_call_operand.hbm [shape: f32[1,128], index: 3, kind: output, shape index: {1}]  }
   0x1   :  { %10 = vsyncpa [#allocation6], 0 }
   0x2   :  { %11 = vsyncpa [#allocation4], 0 }
   0x3   :  { %12 = vsyncpa [#allocation9], 0  ;;  %s844_s12 = smov [#allocation2]   ;;  %s845_s14 = smov [#allocation5]  }
   0x4   :  { %s19_s13 = sshll.u32 %s844_s12, 4  ;;  %s28_s15 = sshll.u32 %s845_s14, 4  ;;  %s20_s13 = int_to_ptr.vmem [resolvable:$true] %s19_s13  ;;  %s871_s15 = int_to_ptr.vmem [resolvable:$true] %s28_s15 }
   0x5   :  { %s748_s18 = scalar_lea.hbm %s1038_s0, 16 }
   0x6   :  { %p749_p0 = scmp.ne.s32.totalorder %s1038_s0, %s748_s18  ;;  %p752_p1 = scmp.lt.u32.totalorder %s748_s18, %s1038_s0 }
   0x8   :  { %p754_p2 = pnand %p752_p1, %p749_p0 }
   0xa   :  { %757 = shalt.err (!%p754_p2)
}
   0xb   :  { %s758_s23 = scalar_lea.vmem %s20_s13, 16  ;;  %s762_s24 = scalar_lea.vmem %s20_s13, 32 }
   0xc   :  { %p759_p3 = scmp.ne.s32.totalorder %s20_s13, %s758_s23  ;;  %p763_p4 = scmp.lt.s32.totalorder %s20_s13, %s20_s13 }
   0xd   :  { %p764_p5 = scmp.lt.s32.totalorder %s762_s24, %s758_s23 }
   0xf   :  { %p765_p6 = por %p764_p5, %p763_p4 }
  0x11   :  { %p766_p7 = pnand %p765_p6, %p759_p3 }
  0x13   :  { %769 = shalt.err (!%p766_p7)
}
  0x14   :  { %22 = dma.hbm_to_vmem [thread:$0]  %s1038_s0, 16, %s20_s13, [#allocation3]  }
  0x15   :  { %s770_s29 = scalar_lea.hbm %s1039_s1, 4096 }
  0x16   :  { %p771_p8 = scmp.ne.s32.totalorder %s1039_s1, %s770_s29  ;;  %p774_p9 = scmp.lt.u32.totalorder %s770_s29, %s1039_s1 }
  0x18   :  { %p776_p10 = pnand %p774_p9, %p771_p8 }
  0x1a   :  { %779 = shalt.err (!%p776_p10)
}
  0x1b   :  { %s780_s7 = scalar_lea.vmem %s871_s15, 4096  ;;  %p785_p12 = scmp.lt.s32.totalorder %s871_s15, %s871_s15 }
  0x1c   :  { %p781_p11 = scmp.ne.s32.totalorder %s871_s15, %s780_s7  ;;  %p786_p13 = scmp.lt.s32.totalorder %s780_s7, %s780_s7 }
  0x1e   :  { %p787_p0 = por %p786_p13, %p785_p12 }
  0x20   :  { %p788_p1 = pnand %p787_p0, %p781_p11 }
  0x22   :  { %791 = shalt.err (!%p788_p1)
}
  0x23   :  { %s846_s0 = smov 128   ;;  %s847_s8 = smov 8  }
  0x24   :  { %34 = dma.hbm_to_vmem [thread:$0]  %s1039_s1, 4096, %s871_s15, [#allocation6], %s846_s0, %s846_s0, %s847_s8  }
  0x25   :  { %836 = dma.done.wait [#allocation3], 16  }
  0x26   :  { %837 = vsyncadd [#allocation3], 4294967280 }
  0x27   :  { %838 = dma.done.wait [#allocation6], 4096  }
  0x28   :  { %839 = vsyncadd [#allocation6], 4294963200  ;;  %v46_v0 = vlaneseq  ;;  %v911_v6 = vld [vmem:[#allocation2] sm:$0x1]  ;;  %v848_v11 = vmov 0.0   ;;  %v195_v36 = vld [vmem:[#allocation5 + $0x80] sm:$0xff] }
  0x29   :  { %v196_v37 = vld [vmem:[#allocation5 + $0x88] sm:$0xff]  ;;  %v179_v38 = vld [vmem:[#allocation5] sm:$0xff]  ;;  %v197_v42 = vld [vmem:[#allocation5 + $0x90] sm:$0xff]  ;;  %s849_s1 = smov [#allocation8]  }
  0x2a   :  { %v905_v1 = vshrl.u32 %v46_v0, 7  ;;  %v180_v41 = vld [vmem:[#allocation5 + $0x8] sm:$0xff]  ;;  %v198_v43 = vld [vmem:[#allocation5 + $0x98] sm:$0xff]  ;;  %v581_v45 = vpack.c.bf16 %v196_v37, %v195_v36  ;;  %v181_v46 = vld [vmem:[#allocation5 + $0x10] sm:$0xff]  ;;  %s454_s11 = sshll.u32 %s849_s1, 4  ;;  %s455_s11 = int_to_ptr.vmem [resolvable:$true] %s454_s11 }
  0x2b   :  { %v182_v47 = vld [vmem:[#allocation5 + $0x18] sm:$0xff]  ;;  %v583_v50 = vpack.c.bf16 %v180_v41, %v179_v38  ;;  %v585_v51 = vpack.c.bf16 %v198_v43, %v197_v42  ;;  %v199_v52 = vld [vmem:[#allocation5 + $0xa0] sm:$0xff]  ;;  %v200_v53 = vld [vmem:[#allocation5 + $0xa8] sm:$0xff]  ;;  %s792_s12 = scalar_lea.vmem %s455_s11, 16  ;;  %s796_s13 = scalar_lea.vmem %s455_s11, 32 }
  0x2c   :  { %v81_v2 = vsub.s32 0, %v905_v1  ;;  %v63_v3 = vadd.s32 128, %v905_v1  ;;  %v48_v4 = vadd.s32 8, %v905_v1  ;;  %v64_v5 = vadd.s32 136, %v905_v1  ;;  %582 = vmatprep.subr.bf16.mxu0 %v581_v45  ;;  %613 = vmatprep.subr.bf16.mxu1 %v581_v45  ;;  %v183_v59 = vld [vmem:[#allocation5 + $0x20] sm:$0xff]  ;;  %v184_v60 = vld [vmem:[#allocation5 + $0x28] sm:$0xff]  ;;  %p793_p2 = scmp.ne.s32.totalorder %s455_s11, %s792_s12  ;;  %p797_p3 = scmp.lt.s32.totalorder %s455_s11, %s455_s11 }
  0x2d   :  { %v49_v8 = vadd.s32 16, %v905_v1  ;;  %v65_v9 = vadd.s32 144, %v905_v1  ;;  %v50_v10 = vadd.s32 24, %v905_v1  ;;  %v66_v17 = vadd.s32 152, %v905_v1  ;;  %584 = vmatpush3.bf16.msra.mxu0 %v583_v50  ;;  %621 = vmatpush3.bf16.msra.mxu1 %v583_v50  ;;  %v201_v63 = vld [vmem:[#allocation5 + $0xb0] sm:$0xff]  ;;  %v202_v0 = vld [vmem:[#allocation5 + $0xb8] sm:$0xff]  ;;  %p798_p4 = scmp.lt.s32.totalorder %s796_s13, %s792_s12 }
  0x2e   :  { %v914_v7 = vrot.slane %v911_v6, %v81_v2  ;;  %v51_v21 = vadd.s32 32, %v905_v1  ;;  %v67_v22 = vadd.s32 160, %v905_v1  ;;  %v52_v26 = vadd.s32 40, %v905_v1  ;;  %586 = vmatprep.subr.bf16.mxu0 %v585_v51  ;;  %614 = vmatprep.subr.bf16.mxu1 %v585_v51  ;;  %v207_v36 = vld [vmem:[#allocation5 + $0xe0] sm:$0xff]  ;;  %v208_v37 = vld [vmem:[#allocation5 + $0xe8] sm:$0xff] }
  0x2f   :  { %v68_v27 = vadd.s32 168, %v905_v1  ;;  %v53_v31 = vadd.s32 48, %v905_v1  ;;  %v69_v32 = vadd.s32 176, %v905_v1  ;;  %v54_v39 = vadd.s32 56, %v905_v1  ;;  %v191_v43 = vld [vmem:[#allocation5 + $0x60] sm:$0xff]  ;;  %p799_p5 = por %p798_p4, %p797_p3 }
  0x30   :  { %vm83_vm0 = vcmp.eq.s32.totalorder %v905_v1, %v914_v7  ;;  %vm99_vm1 = vcmp.eq.s32.totalorder %v63_v3, %v914_v7  ;;  %vm84_vm2 = vcmp.eq.s32.totalorder %v48_v4, %v914_v7  ;;  %vm100_vm3 = vcmp.eq.s32.totalorder %v64_v5, %v914_v7 }
  0x31   :  { %v469_v12 = vsel %vm83_vm0, 1.0, %v848_v11  ;;  %v485_v13 = vsel %vm99_vm1, 1.0, %v848_v11  ;;  %v470_v14 = vsel %vm84_vm2, 1.0, %v848_v11  ;;  %v486_v15 = vsel %vm100_vm3, 1.0, %v848_v11  ;;  %p800_p6 = pnand %p799_p5, %p793_p2 }
  0x32   :  { %v636_v16 = vpack.i.bf16 %v469_v12, %v485_v13  ;;  %vm85_vm4 = vcmp.eq.s32.totalorder %v49_v8, %v914_v7  ;;  %vm101_vm5 = vcmp.eq.s32.totalorder %v65_v9, %v914_v7  ;;  %v638_v18 = vpack.i.bf16 %v470_v14, %v486_v15  ;;  %v185_v9 = vld [vmem:[#allocation5 + $0x30] sm:$0xff]  ;;  %v203_v14 = vld [vmem:[#allocation5 + $0xc0] sm:$0xff]  ;;  %v204_v15 = vld [vmem:[#allocation5 + $0xc8] sm:$0xff] }
  0x33   :  { %v471_v19 = vsel %vm85_vm4, 1.0, %v848_v11  ;;  %v487_v20 = vsel %vm101_vm5, 1.0, %v848_v11  ;;  %vm86_vm6 = vcmp.eq.s32.totalorder %v50_v10, %v914_v7  ;;  %vm102_vm7 = vcmp.eq.s32.totalorder %v66_v17, %v914_v7  ;;  %v186_v10 = vld [vmem:[#allocation5 + $0x38] sm:$0xff] }
  0x34   :  { %637 = vxpose.xlu0.b32.start [1/16] %v636_v16, 128  ;;  %v640_v23 = vpack.i.bf16 %v471_v19, %v487_v20  ;;  %v472_v24 = vsel %vm86_vm6, 1.0, %v848_v11  ;;  %v488_v25 = vsel %vm102_vm7, 1.0, %v848_v11  ;;  %vm87_vm8 = vcmp.eq.s32.totalorder %v51_v21, %v914_v7  ;;  %v187_v21 = vld [vmem:[#allocation5 + $0x40] sm:$0xff] }
  0x35   :  { %vm103_vm9 = vcmp.eq.s32.totalorder %v67_v22, %v914_v7  ;;  %v642_v28 = vpack.i.bf16 %v472_v24, %v488_v25  ;;  %v473_v29 = vsel %vm87_vm8, 1.0, %v848_v11  ;;  %vm88_vm10 = vcmp.eq.s32.totalorder %v52_v26, %v914_v7  ;;  %v188_v22 = vld [vmem:[#allocation5 + $0x48] sm:$0xff]  ;;  %v205_v25 = vld [vmem:[#allocation5 + $0xd0] sm:$0xff]  ;;  %v206_v26 = vld [vmem:[#allocation5 + $0xd8] sm:$0xff] }
  0x36   :  { %v489_v30 = vsel %vm103_vm9, 1.0, %v848_v11  ;;  %vm104_vm11 = vcmp.eq.s32.totalorder %v68_v27, %v914_v7  ;;  %v474_v34 = vsel %vm88_vm10, 1.0, %v848_v11  ;;  %vm89_vm12 = vcmp.eq.s32.totalorder %v53_v31, %v914_v7 }
  0x37   :  { %v644_v33 = vpack.i.bf16 %v473_v29, %v489_v30  ;;  %v490_v35 = vsel %vm104_vm11, 1.0, %v848_v11  ;;  %vm105_vm13 = vcmp.eq.s32.totalorder %v69_v32, %v914_v7  ;;  %v70_v40 = vadd.s32 184, %v905_v1  ;;  %v189_v32 = vld [vmem:[#allocation5 + $0x50] sm:$0xff] }
  0x38   :  { %639 = vxpose.xlu0.b32.cont [2/16] %v638_v18, 128  ;;  %v646_v44 = vpack.i.bf16 %v474_v34, %v490_v35  ;;  %v475_v48 = vsel %vm89_vm12, 1.0, %v848_v11  ;;  %v491_v49 = vsel %vm105_vm13, 1.0, %v848_v11  ;;  %vm90_vm14 = vcmp.eq.s32.totalorder %v54_v39, %v914_v7 }
  0x39   :  { %vm106_vm15 = vcmp.eq.s32.totalorder %v70_v40, %v914_v7  ;;  %v55_v54 = vadd.s32 64, %v905_v1  ;;  %v71_v55 = vadd.s32 192, %v905_v1  ;;  %v587_v56 = vpack.c.bf16 %v182_v47, %v181_v46  ;;  %v209_v47 = vld [vmem:[#allocation5 + $0xf0] sm:$0xff] }
  0x3a   :  { %v648_v57 = vpack.i.bf16 %v475_v48, %v491_v49  ;;  %v589_v58 = vpack.c.bf16 %v200_v53, %v199_v52  ;;  %v476_v61 = vsel %vm90_vm14, 1.0, %v848_v11  ;;  %v492_v62 = vsel %vm106_vm15, 1.0, %v848_v11  ;;  %v210_v48 = vld [vmem:[#allocation5 + $0xf8] sm:$0xff] }
  0x3b   :  { %vm91_vm0 = vcmp.eq.s32.totalorder %v55_v54, %v914_v7  ;;  %vm107_vm1 = vcmp.eq.s32.totalorder %v71_v55, %v914_v7  ;;  %v56_v2 = vadd.s32 72, %v905_v1  ;;  %v72_v3 = vadd.s32 200, %v905_v1  ;;  %588 = vmatpush3.bf16.msra.mxu0 %v587_v56  ;;  %622 = vmatpush3.bf16.msra.mxu1 %v587_v56  ;;  %v193_v54 = vld [vmem:[#allocation5 + $0x70] sm:$0xff]  ;;  %v194_v55 = vld [vmem:[#allocation5 + $0x78] sm:$0xff] }
  0x3c   :  { %641 = vxpose.xlu0.b32.cont [3/16] %v640_v23, 128  ;;  %v591_v4 = vpack.c.bf16 %v184_v60, %v183_v59  ;;  %v650_v5 = vpack.i.bf16 %v476_v61, %v492_v62  ;;  %590 = vmatprep.subr.bf16.mxu0 %v589_v58  ;;  %v593_v8 = vpack.c.bf16 %v202_v0, %v201_v63  ;;  %v477_v12 = vsel %vm91_vm0, 1.0, %v848_v11 }
  0x3d   :  { %v493_v13 = vsel %vm107_vm1, 1.0, %v848_v11  ;;  %615 = vmatprep.subr.bf16.mxu1 %v589_v58  ;;  %vm92_vm2 = vcmp.eq.s32.totalorder %v56_v2, %v914_v7  ;;  %vm108_vm3 = vcmp.eq.s32.totalorder %v72_v3, %v914_v7  ;;  %v57_v16 = vadd.s32 80, %v905_v1 }
  0x3e   :  { %v73_v17 = vadd.s32 208, %v905_v1  ;;  %v595_v18 = vpack.c.bf16 %v186_v10, %v185_v9  ;;  %v652_v19 = vpack.i.bf16 %v477_v12, %v493_v13  ;;  %v597_v20 = vpack.c.bf16 %v204_v15, %v203_v14 }
  0x3f   :  { %592 = vmatpush3.bf16.msra.mxu0 %v591_v4  ;;  %623 = vmatpush3.bf16.msra.mxu1 %v591_v4  ;;  %v478_v23 = vsel %vm92_vm2, 1.0, %v848_v11  ;;  %v494_v24 = vsel %vm108_vm3, 1.0, %v848_v11  ;;  %vm93_vm4 = vcmp.eq.s32.totalorder %v57_v16, %v914_v7  ;;  %v58_v27 = vadd.s32 88, %v905_v1 }
  0x40   :  { %643 = vxpose.xlu0.b32.cont [4/16] %v642_v28, 128  ;;  %594 = vmatprep.subr.bf16.mxu0 %v593_v8  ;;  %vm109_vm5 = vcmp.eq.s32.totalorder %v73_v17, %v914_v7  ;;  %v74_v28 = vadd.s32 216, %v905_v1  ;;  %v599_v29 = vpack.c.bf16 %v188_v22, %v187_v21  ;;  %v654_v30 = vpack.i.bf16 %v478_v23, %v494_v24 }
  0x41   :  { %616 = vmatprep.subr.bf16.mxu1 %v593_v8  ;;  %v601_v31 = vpack.c.bf16 %v206_v26, %v205_v25  ;;  %v479_v34 = vsel %vm93_vm4, 1.0, %v848_v11  ;;  %v495_v35 = vsel %vm109_vm5, 1.0, %v848_v11  ;;  %vm94_vm6 = vcmp.eq.s32.totalorder %v58_v27, %v914_v7 }
  0x42   :  { %vm110_vm7 = vcmp.eq.s32.totalorder %v74_v28, %v914_v7  ;;  %v59_v38 = vadd.s32 96, %v905_v1  ;;  %v75_v39 = vadd.s32 224, %v905_v1  ;;  %v656_v41 = vpack.i.bf16 %v479_v34, %v495_v35 }
  0x43   :  { %596 = vmatpush3.bf16.msra.mxu0 %v595_v18  ;;  %624 = vmatpush3.bf16.msra.mxu1 %v595_v18  ;;  %v605_v42 = vpack.c.bf16 %v208_v37, %v207_v36  ;;  %v480_v45 = vsel %vm94_vm6, 1.0, %v848_v11  ;;  %v496_v46 = vsel %vm110_vm7, 1.0, %v848_v11  ;;  %v60_v49 = vadd.s32 104, %v905_v1 }
  0x44   :  { %645 = vxpose.xlu0.b32.cont [5/16] %v644_v33, 128  ;;  %598 = vmatprep.subr.bf16.mxu0 %v597_v20  ;;  %v190_v33 = vld [vmem:[#allocation5 + $0x58] sm:$0xff]  ;;  %vm95_vm8 = vcmp.eq.s32.totalorder %v59_v38, %v914_v7  ;;  %vm111_vm9 = vcmp.eq.s32.totalorder %v75_v39, %v914_v7  ;;  %v76_v50 = vadd.s32 232, %v905_v1  ;;  %v658_v52 = vpack.i.bf16 %v480_v45, %v496_v46 }
  0x45   :  { %617 = vmatprep.subr.bf16.mxu1 %v597_v20  ;;  %v603_v40 = vpack.c.bf16 %v190_v33, %v189_v32  ;;  %v609_v53 = vpack.c.bf16 %v210_v48, %v209_v47  ;;  %v481_v56 = vsel %vm95_vm8, 1.0, %v848_v11  ;;  %vm96_vm10 = vcmp.eq.s32.totalorder %v60_v49, %v914_v7 }
  0x46   :  { %vm112_vm11 = vcmp.eq.s32.totalorder %v76_v50, %v914_v7  ;;  %v61_v58 = vadd.s32 112, %v905_v1  ;;  %v77_v59 = vadd.s32 240, %v905_v1  ;;  %v611_v60 = vpack.c.bf16 %v194_v55, %v193_v54 }
  0x47   :  { %600 = vmatpush3.bf16.msra.mxu0 %v599_v29  ;;  %625 = vmatpush3.bf16.msra.mxu1 %v599_v29  ;;  %v482_v62 = vsel %vm96_vm10, 1.0, %v848_v11  ;;  %v498_v63 = vsel %vm112_vm11, 1.0, %v848_v11  ;;  %v62_v0 = vadd.s32 120, %v905_v1  ;;  %v78_v2 = vadd.s32 248, %v905_v1 }
  0x48   :  { %647 = vxpose.xlu0.b32.cont [6/16] %v646_v44, 128  ;;  %602 = vmatprep.subr.bf16.mxu0 %v601_v31  ;;  %v192_v44 = vld [vmem:[#allocation5 + $0x68] sm:$0xff]  ;;  %vm97_vm12 = vcmp.eq.s32.totalorder %v61_v58, %v914_v7  ;;  %vm113_vm13 = vcmp.eq.s32.totalorder %v77_v59, %v914_v7  ;;  %v662_v3 = vpack.i.bf16 %v482_v62, %v498_v63  ;;  %vm42_vm0 = vcmp.gt.s32.totalorder %v911_v6, 0 }
  0x49   :  { %618 = vmatprep.subr.bf16.mxu1 %v601_v31  ;;  %v607_v51 = vpack.c.bf16 %v192_v44, %v191_v43  ;;  %v483_v4 = vsel %vm97_vm12, 1.0, %v848_v11  ;;  %vm98_vm14 = vcmp.eq.s32.totalorder %v62_v0, %v914_v7  ;;  %vm114_vm15 = vcmp.eq.s32.totalorder %v78_v2, %v914_v7 }
  0x4a   :  { %v484_v9 = vsel %vm98_vm14, 1.0, %v848_v11  ;;  %v500_v10 = vsel %vm114_vm15, 1.0, %v848_v11  ;;  %v468_v59 = vsel %vm42_vm0, 1.0, %v848_v11 }
  0x4b   :  { %604 = vmatpush3.bf16.msra.mxu0 %v603_v40  ;;  %626 = vmatpush3.bf16.msra.mxu1 %v603_v40  ;;  %v666_v1 = vpack.i.bf16 %v484_v9, %v500_v10  ;;  %45 = vst [vmem:[#allocation8] sm:$0x1] %v468_v59 }
  0x4c   :  { %649 = vxpose.xlu0.b32.cont [7/16] %v648_v57, 128  ;;  %606 = vmatprep.subr.bf16.mxu0 %v605_v42  ;;  %v497_v57 = vsel %vm111_vm9, 1.0, %v848_v11 }
  0x4d   :  { %619 = vmatprep.subr.bf16.mxu1 %v605_v42  ;;  %v660_v61 = vpack.i.bf16 %v481_v56, %v497_v57 }
  0x4f   :  { %608 = vmatpush3.bf16.msra.mxu0 %v607_v51  ;;  %627 = vmatpush3.bf16.msra.mxu1 %v607_v51 }
  0x50   :  { %651 = vxpose.xlu0.b32.cont [8/16] %v650_v5, 128  ;;  %610 = vmatprep.subr.bf16.mxu0 %v609_v53  ;;  %v499_v5 = vsel %vm113_vm13, 1.0, %v848_v11 }
  0x51   :  { %620 = vmatprep.subr.bf16.mxu1 %v609_v53  ;;  %v664_v8 = vpack.i.bf16 %v483_v4, %v499_v5 }
  0x53   :  { %612 = vmatpush3.bf16.msra.mxu0 %v611_v60  ;;  %628 = vmatpush3.bf16.msra.mxu1 %v611_v60 }
  0x54   :  { %653 = vxpose.xlu0.b32.cont [9/16] %v652_v19, 128 }
  0x58   :  { %655 = vxpose.xlu0.b32.cont [10/16] %v654_v30, 128 }
  0x5c   :  { %657 = vxpose.xlu0.b32.cont [11/16] %v656_v41, 128 }
  0x60   :  { %659 = vxpose.xlu0.b32.cont [12/16] %v658_v52, 128 }
  0x64   :  { %661 = vxpose.xlu0.b32.cont [13/16] %v660_v61, 128 }
  0x68   :  { %663 = vxpose.xlu0.b32.cont [14/16] %v662_v3, 128 }
  0x6c   :  { %665 = vxpose.xlu0.b32.cont [15/16] %v664_v8, 128 }
  0x70   :  { %667 = vxpose.xlu0.b32.end [16/16] %v666_v1, 128 }
  0xb4   :  { %v668_v12 = vpop.trf.xlu0 }
  0xb5   :  { %v669_v13 = vunpack.i.l.bf16 %v668_v12  ;;  %v672_v14 = vunpack.i.h.bf16 %v668_v12 }
  0xb7   :  { %339 = vmatprep.mubr.f32.mxu0 %v669_v13 }
  0xb8   :  { %v673_v15 = vpop.trf.xlu0  ;;  %340 = vmatmul.mubr.f32.vlgmr.msra.gmra.mrb[0].mxu0 %v672_v14 }
  0xb9   :  { %v674_v16 = vunpack.i.l.bf16 %v673_v15  ;;  %v677_v17 = vunpack.i.h.bf16 %v673_v15 }
  0xbb   :  { %344 = vmatprep.mubr.f32.mxu0 %v674_v16 }
  0xbc   :  { %v678_v18 = vpop.trf.xlu0  ;;  %345 = vmatmul.mubr.f32.gmra.mrb[2].mxu0 %v677_v17 }
  0xbd   :  { %v679_v7 = vunpack.i.l.bf16 %v678_v18  ;;  %v682_v19 = vunpack.i.h.bf16 %v678_v18 }
  0xbf   :  { %349 = vmatprep.mubr.f32.mxu0 %v679_v7 }
  0xc0   :  { %v683_v20 = vpop.trf.xlu0  ;;  %350 = vmatmul.mubr.f32.gmra.mrb[4].mxu0 %v682_v19 }
  0xc1   :  { %v684_v21 = vunpack.i.l.bf16 %v683_v20  ;;  %v687_v22 = vunpack.i.h.bf16 %v683_v20 }
  0xc3   :  { %354 = vmatprep.mubr.f32.mxu0 %v684_v21 }
  0xc4   :  { %v688_v23 = vpop.trf.xlu0  ;;  %355 = vmatmul.mubr.f32.gmra.mrb[6].mxu0 %v687_v22 }
  0xc5   :  { %v689_v24 = vunpack.i.l.bf16 %v688_v23  ;;  %v692_v25 = vunpack.i.h.bf16 %v688_v23 }
  0xc7   :  { %359 = vmatprep.mubr.f32.mxu0 %v689_v24 }
  0xc8   :  { %v693_v26 = vpop.trf.xlu0  ;;  %360 = vmatmul.mubr.f32.gmra.mrb[8].mxu0 %v692_v25 }
  0xc9   :  { %v694_v27 = vunpack.i.l.bf16 %v693_v26  ;;  %v697_v28 = vunpack.i.h.bf16 %v693_v26 }
  0xcb   :  { %364 = vmatprep.mubr.f32.mxu0 %v694_v27 }
  0xcc   :  { %v698_v29 = vpop.trf.xlu0  ;;  %365 = vmatmul.mubr.f32.gmra.mrb[10].mxu0 %v697_v28 }
  0xcd   :  { %v699_v30 = vunpack.i.l.bf16 %v698_v29  ;;  %v702_v31 = vunpack.i.h.bf16 %v698_v29 }
  0xcf   :  { %369 = vmatprep.mubr.f32.mxu0 %v699_v30 }
  0xd0   :  { %v703_v32 = vpop.trf.xlu0  ;;  %370 = vmatmul.mubr.f32.gmra.mrb[12].mxu0 %v702_v31 }
  0xd1   :  { %v704_v33 = vunpack.i.l.bf16 %v703_v32  ;;  %v707_v34 = vunpack.i.h.bf16 %v703_v32 }
  0xd3   :  { %374 = vmatprep.mubr.f32.mxu0 %v704_v33 }
  0xd4   :  { %v708_v35 = vpop.trf.xlu0  ;;  %375 = vmatmul.mubr.f32.gmra.mrb[14].mxu0 %v707_v34 }
  0xd5   :  { %v709_v36 = vunpack.i.l.bf16 %v708_v35  ;;  %v712_v37 = vunpack.i.h.bf16 %v708_v35 }
  0xd7   :  { %379 = vmatprep.mubr.f32.mxu1 %v709_v36 }
  0xd8   :  { %v713_v38 = vpop.trf.xlu0  ;;  %380 = vmatmul.mubr.f32.vlgmr.msra.gmra.mrb[0].mxu1 %v712_v37 }
  0xd9   :  { %v714_v39 = vunpack.i.l.bf16 %v713_v38  ;;  %v717_v40 = vunpack.i.h.bf16 %v713_v38 }
  0xdb   :  { %384 = vmatprep.mubr.f32.mxu1 %v714_v39 }
  0xdc   :  { %v718_v41 = vpop.trf.xlu0  ;;  %385 = vmatmul.mubr.f32.gmra.mrb[2].mxu1 %v717_v40 }
  0xdd   :  { %v719_v42 = vunpack.i.l.bf16 %v718_v41  ;;  %v722_v43 = vunpack.i.h.bf16 %v718_v41 }
  0xdf   :  { %389 = vmatprep.mubr.f32.mxu1 %v719_v42 }
  0xe0   :  { %v723_v44 = vpop.trf.xlu0  ;;  %390 = vmatmul.mubr.f32.gmra.mrb[4].mxu1 %v722_v43 }
  0xe1   :  { %v724_v45 = vunpack.i.l.bf16 %v723_v44  ;;  %v727_v46 = vunpack.i.h.bf16 %v723_v44 }
  0xe3   :  { %394 = vmatprep.mubr.f32.mxu1 %v724_v45 }
  0xe4   :  { %v728_v47 = vpop.trf.xlu0  ;;  %395 = vmatmul.mubr.f32.gmra.mrb[6].mxu1 %v727_v46 }
  0xe5   :  { %v729_v48 = vunpack.i.l.bf16 %v728_v47  ;;  %v732_v49 = vunpack.i.h.bf16 %v728_v47 }
  0xe7   :  { %399 = vmatprep.mubr.f32.mxu1 %v729_v48 }
  0xe8   :  { %v733_v50 = vpop.trf.xlu0  ;;  %400 = vmatmul.mubr.f32.gmra.mrb[8].mxu1 %v732_v49 }
  0xe9   :  { %v734_v51 = vunpack.i.l.bf16 %v733_v50  ;;  %v737_v52 = vunpack.i.h.bf16 %v733_v50 }
  0xeb   :  { %404 = vmatprep.mubr.f32.mxu1 %v734_v51 }
  0xec   :  { %v738_v53 = vpop.trf.xlu0  ;;  %405 = vmatmul.mubr.f32.gmra.mrb[10].mxu1 %v737_v52 }
  0xed   :  { %v739_v54 = vunpack.i.l.bf16 %v738_v53  ;;  %v742_v55 = vunpack.i.h.bf16 %v738_v53 }
  0xef   :  { %409 = vmatprep.mubr.f32.mxu1 %v739_v54 }
  0xf0   :  { %v743_v56 = vpop.trf.xlu0  ;;  %410 = vmatmul.mubr.f32.gmra.mrb[12].mxu1 %v742_v55 }
  0xf1   :  { %v747_v57 = vunpack.i.h.bf16 %v743_v56  ;;  %v744_v58 = vunpack.i.l.bf16 %v743_v56 }
  0xf3   :  { %414 = vmatprep.mubr.f32.mxu1 %v744_v58 }
  0xf4   :  { %415 = vmatmul.mubr.f32.gmra.mrb[14].mxu1 %v747_v57 }
  0xf5   :  { %803 = shalt.err (!%p800_p6)
}
  0xf6   :  { %s804_s16 = scalar_lea.hbm %s1041_s3, 16 }
  0xf7   :  { %p805_p7 = scmp.ne.s32.totalorder %s1041_s3, %s804_s16  ;;  %p808_p8 = scmp.lt.u32.totalorder %s804_s16, %s1041_s3 }
  0xf9   :  { %p810_p9 = pnand %p808_p8, %p805_p7 }
  0xfb   :  { %813 = shalt.err (!%p810_p9)
}
  0xfc   :  { %457 = dma.vmem_to_hbm [thread:$0]  %s455_s11, 16, %s1041_s3, [#allocation9]  }
  0xfd   :  { %s850_s3 = smov [#allocation7]  }
  0xfe   :  { %s441_s23 = sshll.u32 %s850_s3, 4  ;;  %s442_s23 = int_to_ptr.vmem [resolvable:$true] %s441_s23 }
  0xff   :  { %s814_s24 = scalar_lea.vmem %s442_s23, 2048  ;;  %p819_p11 = scmp.lt.s32.totalorder %s442_s23, %s442_s23 }
 0x100   :  { %p815_p10 = scmp.ne.s32.totalorder %s442_s23, %s814_s24  ;;  %p820_p12 = scmp.lt.s32.totalorder %s814_s24, %s814_s24 }
 0x102   :  { %p821_p13 = por %p820_p12, %p819_p11 }
 0x104   :  { %p822_p0 = pnand %p821_p13, %p815_p10 }
 0x18b   :  { %v533_v6 = vpop.f32.mrb[0].mxu0 }
 0x18c   :  { %v534_v11 = vpop.f32.mrb[1].mxu0 }
 0x18d   :  { %v535_v60 = vadd.f32 %v534_v11, %v533_v6 }
 0x18f   :  { %420 = vst [vmem:[#allocation7] sm:$0xff] %v535_v60  ;;  %v536_v61 = vpop.f32.mrb[2].mxu0 }
 0x190   :  { %v537_v62 = vpop.f32.mrb[3].mxu0 }
 0x191   :  { %v538_v63 = vadd.f32 %v537_v62, %v536_v61 }
 0x193   :  { %421 = vst [vmem:[#allocation7 + $0x8] sm:$0xff] %v538_v63  ;;  %v539_v0 = vpop.f32.mrb[4].mxu0 }
 0x194   :  { %v540_v2 = vpop.f32.mrb[5].mxu0 }
 0x195   :  { %v541_v3 = vadd.f32 %v540_v2, %v539_v0 }
 0x197   :  { %422 = vst [vmem:[#allocation7 + $0x10] sm:$0xff] %v541_v3  ;;  %v542_v4 = vpop.f32.mrb[6].mxu0 }
 0x198   :  { %v543_v5 = vpop.f32.mrb[7].mxu0 }
 0x199   :  { %v544_v8 = vadd.f32 %v543_v5, %v542_v4 }
 0x19b   :  { %423 = vst [vmem:[#allocation7 + $0x18] sm:$0xff] %v544_v8  ;;  %v545_v9 = vpop.f32.mrb[8].mxu0 }
 0x19c   :  { %v546_v10 = vpop.f32.mrb[9].mxu0 }
 0x19d   :  { %v547_v1 = vadd.f32 %v546_v10, %v545_v9 }
 0x19f   :  { %424 = vst [vmem:[#allocation7 + $0x20] sm:$0xff] %v547_v1  ;;  %v548_v12 = vpop.f32.mrb[10].mxu0 }
 0x1a0   :  { %v549_v13 = vpop.f32.mrb[11].mxu0 }
 0x1a1   :  { %v550_v14 = vadd.f32 %v549_v13, %v548_v12 }
 0x1a3   :  { %425 = vst [vmem:[#allocation7 + $0x28] sm:$0xff] %v550_v14  ;;  %v551_v15 = vpop.f32.mrb[12].mxu0 }
 0x1a4   :  { %v552_v16 = vpop.f32.mrb[13].mxu0 }
 0x1a5   :  { %v553_v17 = vadd.f32 %v552_v16, %v551_v15 }
 0x1a7   :  { %426 = vst [vmem:[#allocation7 + $0x30] sm:$0xff] %v553_v17  ;;  %v554_v18 = vpop.f32.mrb[14].mxu0 }
 0x1a8   :  { %v555_v7 = vpop.f32.mrb[15].mxu0 }
 0x1a9   :  { %v556_v19 = vadd.f32 %v555_v7, %v554_v18 }
 0x1ab   :  { %427 = vst [vmem:[#allocation7 + $0x38] sm:$0xff] %v556_v19  ;;  %v557_v20 = vpop.f32.mrb[0].mxu1 }
 0x1ac   :  { %v558_v21 = vpop.f32.mrb[1].mxu1 }
 0x1ad   :  { %v559_v22 = vadd.f32 %v558_v21, %v557_v20 }
 0x1af   :  { %428 = vst [vmem:[#allocation7 + $0x40] sm:$0xff] %v559_v22  ;;  %v560_v23 = vpop.f32.mrb[2].mxu1 }
 0x1b0   :  { %v561_v24 = vpop.f32.mrb[3].mxu1 }
 0x1b1   :  { %v562_v25 = vadd.f32 %v561_v24, %v560_v23 }
 0x1b3   :  { %429 = vst [vmem:[#allocation7 + $0x48] sm:$0xff] %v562_v25  ;;  %v563_v26 = vpop.f32.mrb[4].mxu1 }
 0x1b4   :  { %v564_v27 = vpop.f32.mrb[5].mxu1 }
 0x1b5   :  { %v565_v28 = vadd.f32 %v564_v27, %v563_v26 }
 0x1b7   :  { %430 = vst [vmem:[#allocation7 + $0x50] sm:$0xff] %v565_v28  ;;  %v566_v29 = vpop.f32.mrb[6].mxu1 }
 0x1b8   :  { %v567_v30 = vpop.f32.mrb[7].mxu1 }
 0x1b9   :  { %v568_v31 = vadd.f32 %v567_v30, %v566_v29 }
 0x1bb   :  { %431 = vst [vmem:[#allocation7 + $0x58] sm:$0xff] %v568_v31  ;;  %v569_v32 = vpop.f32.mrb[8].mxu1 }
 0x1bc   :  { %v570_v33 = vpop.f32.mrb[9].mxu1 }
 0x1bd   :  { %v571_v34 = vadd.f32 %v570_v33, %v569_v32 }
 0x1bf   :  { %432 = vst [vmem:[#allocation7 + $0x60] sm:$0xff] %v571_v34  ;;  %v572_v35 = vpop.f32.mrb[10].mxu1 }
 0x1c0   :  { %v573_v36 = vpop.f32.mrb[11].mxu1 }
 0x1c1   :  { %v574_v37 = vadd.f32 %v573_v36, %v572_v35 }
 0x1c3   :  { %433 = vst [vmem:[#allocation7 + $0x68] sm:$0xff] %v574_v37  ;;  %v575_v38 = vpop.f32.mrb[12].mxu1 }
 0x1c4   :  { %v576_v39 = vpop.f32.mrb[13].mxu1 }
 0x1c5   :  { %v577_v40 = vadd.f32 %v576_v39, %v575_v38 }
 0x1c7   :  { %434 = vst [vmem:[#allocation7 + $0x70] sm:$0xff] %v577_v40  ;;  %v578_v41 = vpop.f32.mrb[14].mxu1 }
 0x1c8   :  { %v579_v42 = vpop.f32.mrb[15].mxu1 }
 0x1c9   :  { %v580_v43 = vadd.f32 %v579_v42, %v578_v41 }
 0x1cb   :  { %435 = vst [vmem:[#allocation7 + $0x78] sm:$0xff] %v580_v43 }
 0x1cc   :  { %825 = shalt.err (!%p822_p0)
}
 0x1cd   :  { %s826_s27 = scalar_lea.hbm %s1040_s2, 2048 }
 0x1ce   :  { %p827_p1 = scmp.ne.s32.totalorder %s1040_s2, %s826_s27  ;;  %p830_p2 = scmp.lt.u32.totalorder %s826_s27, %s1040_s2 }
 0x1d0   :  { %p832_p3 = pnand %p830_p2, %p827_p1 }
 0x1d2   :  { %835 = shalt.err (!%p832_p3)
}
 0x1d3   :  { %447 = dma.vmem_to_hbm [thread:$0]  %s442_s23, 2048, %s1040_s2, [#allocation4], %s846_s0, %s846_s0, %s847_s8  }
 0x1d4   :  { %840 = dma.done.wait [#allocation4], 2048  }
 0x1d5   :  { %841 = vsyncadd [#allocation4], 4294965248 }
 0x1d6   :  { %842 = dma.done.wait [#allocation9], 16  }
 0x1d7   :  { %843 = vsyncadd [#allocation9], 4294967280 }
 0x1d8   :  { %464 = vsyncpa [#allocation3], 1 }
 0x1d9   :  { %465 = vsyncpa [#allocation6], 1 }
 0x1da   :  { %466 = vsyncpa [#allocation4], 1 }
 0x1db   :  { %467 = vsyncpa [#allocation9], 1 }

// kernel: tpu_custom_call.1
= control target key start
LH: loop header
LB: loop body
LE: loop exit
PB: predicated region body
PF: predicated region fallthrough
CT: control target
= control target key end

     0   :  { %9 = vsyncpa [#allocation3], 0  ;;  %s1038_s0 = inlined_call_operand.hbm [shape: s32[1,128], index: 0, kind: input, shape index: {}]   ;;  %s1039_s1 = inlined_call_operand.hbm [shape: f32[256,128], index: 1, kind: input, shape index: {}]   ;;  %s1040_s2 = inlined_call_operand.hbm [shape: f32[128,128], index: 2, kind: output, shape index: {0}]   ;;  %s1041_s3 = inlined_call_operand.hbm [shape: f32[1,128], index: 3, kind: output, shape index: {1}]  }
   0x1   :  { %10 = vsyncpa [#allocation6], 0 }
   0x2   :  { %11 = vsyncpa [#allocation4], 0 }
   0x3   :  { %12 = vsyncpa [#allocation9], 0  ;;  %s844_s12 = smov [#allocation2]   ;;  %s845_s14 = smov [#allocation5]  }
   0x4   :  { %s19_s13 = sshll.u32 %s844_s12, 4  ;;  %s28_s15 = sshll.u32 %s845_s14, 4  ;;  %s20_s13 = int_to_ptr.vmem [resolvable:$true] %s19_s13  ;;  %s871_s15 = int_to_ptr.vmem [resolvable:$true] %s28_s15 }
   0x5   :  { %s748_s18 = scalar_lea.hbm %s1038_s0, 16 }
   0x6   :  { %p749_p0 = scmp.ne.s32.totalorder %s1038_s0, %s748_s18  ;;  %p752_p1 = scmp.lt.u32.totalorder %s748_s18, %s1038_s0 }
   0x8   :  { %p754_p2 = pnand %p752_p1, %p749_p0 }
   0xa   :  { %757 = shalt.err (!%p754_p2)
}
   0xb   :  { %s758_s23 = scalar_lea.vmem %s20_s13, 16  ;;  %s762_s24 = scalar_lea.vmem %s20_s13, 32 }
   0xc   :  { %p759_p3 = scmp.ne.s32.totalorder %s20_s13, %s758_s23  ;;  %p763_p4 = scmp.lt.s32.totalorder %s20_s13, %s20_s13 }
   0xd   :  { %p764_p5 = scmp.lt.s32.totalorder %s762_s24, %s758_s23 }
   0xf   :  { %p765_p6 = por %p764_p5, %p763_p4 }
  0x11   :  { %p766_p7 = pnand %p765_p6, %p759_p3 }
  0x13   :  { %769 = shalt.err (!%p766_p7)
}
  0x14   :  { %22 = dma.hbm_to_vmem [thread:$0]  %s1038_s0, 16, %s20_s13, [#allocation3]  }
  0x15   :  { %s770_s29 = scalar_lea.hbm %s1039_s1, 4096 }
  0x16   :  { %p771_p8 = scmp.ne.s32.totalorder %s1039_s1, %s770_s29  ;;  %p774_p9 = scmp.lt.u32.totalorder %s770_s29, %s1039_s1 }
  0x18   :  { %p776_p10 = pnand %p774_p9, %p771_p8 }
  0x1a   :  { %779 = shalt.err (!%p776_p10)
}
  0x1b   :  { %s780_s7 = scalar_lea.vmem %s871_s15, 4096  ;;  %p785_p12 = scmp.lt.s32.totalorder %s871_s15, %s871_s15 }
  0x1c   :  { %p781_p11 = scmp.ne.s32.totalorder %s871_s15, %s780_s7  ;;  %p786_p13 = scmp.lt.s32.totalorder %s780_s7, %s780_s7 }
  0x1e   :  { %p787_p0 = por %p786_p13, %p785_p12 }
  0x20   :  { %p788_p1 = pnand %p787_p0, %p781_p11 }
  0x22   :  { %791 = shalt.err (!%p788_p1)
}
  0x23   :  { %s846_s0 = smov 128   ;;  %s847_s8 = smov 8  }
  0x24   :  { %34 = dma.hbm_to_vmem [thread:$0]  %s1039_s1, 4096, %s871_s15, [#allocation6], %s846_s0, %s846_s0, %s847_s8  }
  0x25   :  { %836 = dma.done.wait [#allocation3], 16  }
  0x26   :  { %837 = vsyncadd [#allocation3], 4294967280 }
  0x27   :  { %838 = dma.done.wait [#allocation6], 4096  }
  0x28   :  { %839 = vsyncadd [#allocation6], 4294963200  ;;  %v46_v0 = vlaneseq  ;;  %v911_v6 = vld [vmem:[#allocation2] sm:$0x1]  ;;  %v848_v11 = vmov 0.0   ;;  %v195_v36 = vld [vmem:[#allocation5 + $0x80] sm:$0xff] }
  0x29   :  { %v196_v37 = vld [vmem:[#allocation5 + $0x88] sm:$0xff]  ;;  %v179_v38 = vld [vmem:[#allocation5] sm:$0xff]  ;;  %v197_v42 = vld [vmem:[#allocation5 + $0x90] sm:$0xff]  ;;  %s849_s1 = smov [#allocation8]  }
  0x2a   :  { %v905_v1 = vshrl.u32 %v46_v0, 7  ;;  %v180_v41 = vld [vmem:[#allocation5 + $0x8] sm:$0xff]  ;;  %v198_v43 = vld [vmem:[#allocation5 + $0x98] sm:$0xff]  ;;  %v581_v45 = vpack.c.bf16 %v196_v37, %v195_v36  ;;  %v181_v46 = vld [vmem:[#allocation5 + $0x10] sm:$0xff]  ;;  %s454_s11 = sshll.u32 %s849_s1, 4  ;;  %s455_s11 = int_to_ptr.vmem [resolvable:$true] %s454_s11 }
  0x2b   :  { %v182_v47 = vld [vmem:[#allocation5 + $0x18] sm:$0xff]  ;;  %v583_v50 = vpack.c.bf16 %v180_v41, %v179_v38  ;;  %v585_v51 = vpack.c.bf16 %v198_v43, %v197_v42  ;;  %v199_v52 = vld [vmem:[#allocation5 + $0xa0] sm:$0xff]  ;;  %v200_v53 = vld [vmem:[#allocation5 + $0xa8] sm:$0xff]  ;;  %s792_s12 = scalar_lea.vmem %s455_s11, 16  ;;  %s796_s13 = scalar_lea.vmem %s455_s11, 32 }
  0x2c   :  { %v81_v2 = vsub.s32 0, %v905_v1  ;;  %v63_v3 = vadd.s32 128, %v905_v1  ;;  %v48_v4 = vadd.s32 8, %v905_v1  ;;  %v64_v5 = vadd.s32 136, %v905_v1  ;;  %582 = vmatprep.subr.bf16.mxu0 %v581_v45  ;;  %613 = vmatprep.subr.bf16.mxu1 %v581_v45  ;;  %v183_v59 = vld [vmem:[#allocation5 + $0x20] sm:$0xff]  ;;  %v184_v60 = vld [vmem:[#allocation5 + $0x28] sm:$0xff]  ;;  %p793_p2 = scmp.ne.s32.totalorder %s455_s11, %s792_s12  ;;  %p797_p3 = scmp.lt.s32.totalorder %s455_s11, %s455_s11 }
  0x2d   :  { %v49_v8 = vadd.s32 16, %v905_v1  ;;  %v65_v9 = vadd.s32 144, %v905_v1  ;;  %v50_v10 = vadd.s32 24, %v905_v1  ;;  %v66_v17 = vadd.s32 152, %v905_v1  ;;  %584 = vmatpush3.bf16.msra.mxu0 %v583_v50  ;;  %621 = vmatpush3.bf16.msra.mxu1 %v583_v50  ;;  %v201_v63 = vld [vmem:[#allocation5 + $0xb0] sm:$0xff]  ;;  %v202_v0 = vld [vmem:[#allocation5 + $0xb8] sm:$0xff]  ;;  %p798_p4 = scmp.lt.s32.totalorder %s796_s13, %s792_s12 }
  0x2e   :  { %v914_v7 = vrot.slane %v911_v6, %v81_v2  ;;  %v51_v21 = vadd.s32 32, %v905_v1  ;;  %v67_v22 = vadd.s32 160, %v905_v1  ;;  %v52_v26 = vadd.s32 40, %v905_v1  ;;  %586 = vmatprep.subr.bf16.mxu0 %v585_v51  ;;  %614 = vmatprep.subr.bf16.mxu1 %v585_v51  ;;  %v207_v36 = vld [vmem:[#allocation5 + $0xe0] sm:$0xff]  ;;  %v208_v37 = vld [vmem:[#allocation5 + $0xe8] sm:$0xff] }
  0x2f   :  { %v68_v27 = vadd.s32 168, %v905_v1  ;;  %v53_v31 = vadd.s32 48, %v905_v1  ;;  %v69_v32 = vadd.s32 176, %v905_v1  ;;  %v54_v39 = vadd.s32 56, %v905_v1  ;;  %v191_v43 = vld [vmem:[#allocation5 + $0x60] sm:$0xff]  ;;  %p799_p5 = por %p798_p4, %p797_p3 }
  0x30   :  { %vm83_vm0 = vcmp.eq.s32.totalorder %v905_v1, %v914_v7  ;;  %vm99_vm1 = vcmp.eq.s32.totalorder %v63_v3, %v914_v7  ;;  %vm84_vm2 = vcmp.eq.s32.totalorder %v48_v4, %v914_v7  ;;  %vm100_vm3 = vcmp.eq.s32.totalorder %v64_v5, %v914_v7 }
  0x31   :  { %v469_v12 = vsel %vm83_vm0, 1.0, %v848_v11  ;;  %v485_v13 = vsel %vm99_vm1, 1.0, %v848_v11  ;;  %v470_v14 = vsel %vm84_vm2, 1.0, %v848_v11  ;;  %v486_v15 = vsel %vm100_vm3, 1.0, %v848_v11  ;;  %p800_p6 = pnand %p799_p5, %p793_p2 }
  0x32   :  { %v636_v16 = vpack.i.bf16 %v469_v12, %v485_v13  ;;  %vm85_vm4 = vcmp.eq.s32.totalorder %v49_v8, %v914_v7  ;;  %vm101_vm5 = vcmp.eq.s32.totalorder %v65_v9, %v914_v7  ;;  %v638_v18 = vpack.i.bf16 %v470_v14, %v486_v15  ;;  %v185_v9 = vld [vmem:[#allocation5 + $0x30] sm:$0xff]  ;;  %v203_v14 = vld [vmem:[#allocation5 + $0xc0] sm:$0xff]  ;;  %v204_v15 = vld [vmem:[#allocation5 + $0xc8] sm:$0xff] }
  0x33   :  { %v471_v19 = vsel %vm85_vm4, 1.0, %v848_v11  ;;  %v487_v20 = vsel %vm101_vm5, 1.0, %v848_v11  ;;  %vm86_vm6 = vcmp.eq.s32.totalorder %v50_v10, %v914_v7  ;;  %vm102_vm7 = vcmp.eq.s32.totalorder %v66_v17, %v914_v7  ;;  %v186_v10 = vld [vmem:[#allocation5 + $0x38] sm:$0xff] }
  0x34   :  { %637 = vxpose.xlu0.b32.start [1/16] %v636_v16, 128  ;;  %v640_v23 = vpack.i.bf16 %v471_v19, %v487_v20  ;;  %v472_v24 = vsel %vm86_vm6, 1.0, %v848_v11  ;;  %v488_v25 = vsel %vm102_vm7, 1.0, %v848_v11  ;;  %vm87_vm8 = vcmp.eq.s32.totalorder %v51_v21, %v914_v7  ;;  %v187_v21 = vld [vmem:[#allocation5 + $0x40] sm:$0xff] }
  0x35   :  { %vm103_vm9 = vcmp.eq.s32.totalorder %v67_v22, %v914_v7  ;;  %v642_v28 = vpack.i.bf16 %v472_v24, %v488_v25  ;;  %v473_v29 = vsel %vm87_vm8, 1.0, %v848_v11  ;;  %vm88_vm10 = vcmp.eq.s32.totalorder %v52_v26, %v914_v7  ;;  %v188_v22 = vld [vmem:[#allocation5 + $0x48] sm:$0xff]  ;;  %v205_v25 = vld [vmem:[#allocation5 + $0xd0] sm:$0xff]  ;;  %v206_v26 = vld [vmem:[#allocation5 + $0xd8] sm:$0xff] }
  0x36   :  { %v489_v30 = vsel %vm103_vm9, 1.0, %v848_v11  ;;  %vm104_vm11 = vcmp.eq.s32.totalorder %v68_v27, %v914_v7  ;;  %v474_v34 = vsel %vm88_vm10, 1.0, %v848_v11  ;;  %vm89_vm12 = vcmp.eq.s32.totalorder %v53_v31, %v914_v7 }
  0x37   :  { %v644_v33 = vpack.i.bf16 %v473_v29, %v489_v30  ;;  %v490_v35 = vsel %vm104_vm11, 1.0, %v848_v11  ;;  %vm105_vm13 = vcmp.eq.s32.totalorder %v69_v32, %v914_v7  ;;  %v70_v40 = vadd.s32 184, %v905_v1  ;;  %v189_v32 = vld [vmem:[#allocation5 + $0x50] sm:$0xff] }
  0x38   :  { %639 = vxpose.xlu0.b32.cont [2/16] %v638_v18, 128  ;;  %v646_v44 = vpack.i.bf16 %v474_v34, %v490_v35  ;;  %v475_v48 = vsel %vm89_vm12, 1.0, %v848_v11  ;;  %v491_v49 = vsel %vm105_vm13, 1.0, %v848_v11  ;;  %vm90_vm14 = vcmp.eq.s32.totalorder %v54_v39, %v914_v7 }
  0x39   :  { %vm106_vm15 = vcmp.eq.s32.totalorder %v70_v40, %v914_v7  ;;  %v55_v54 = vadd.s32 64, %v905_v1  ;;  %v71_v55 = vadd.s32 192, %v905_v1  ;;  %v587_v56 = vpack.c.bf16 %v182_v47, %v181_v46  ;;  %v209_v47 = vld [vmem:[#allocation5 + $0xf0] sm:$0xff] }
  0x3a   :  { %v648_v57 = vpack.i.bf16 %v475_v48, %v491_v49  ;;  %v589_v58 = vpack.c.bf16 %v200_v53, %v199_v52  ;;  %v476_v61 = vsel %vm90_vm14, 1.0, %v848_v11  ;;  %v492_v62 = vsel %vm106_vm15, 1.0, %v848_v11  ;;  %v210_v48 = vld [vmem:[#allocation5 + $0xf8] sm:$0xff] }
  0x3b   :  { %vm91_vm0 = vcmp.eq.s32.totalorder %v55_v54, %v914_v7  ;;  %vm107_vm1 = vcmp.eq.s32.totalorder %v71_v55, %v914_v7  ;;  %v56_v2 = vadd.s32 72, %v905_v1  ;;  %v72_v3 = vadd.s32 200, %v905_v1  ;;  %588 = vmatpush3.bf16.msra.mxu0 %v587_v56  ;;  %622 = vmatpush3.bf16.msra.mxu1 %v587_v56  ;;  %v193_v54 = vld [vmem:[#allocation5 + $0x70] sm:$0xff]  ;;  %v194_v55 = vld [vmem:[#allocation5 + $0x78] sm:$0xff] }
  0x3c   :  { %641 = vxpose.xlu0.b32.cont [3/16] %v640_v23, 128  ;;  %v591_v4 = vpack.c.bf16 %v184_v60, %v183_v59  ;;  %v650_v5 = vpack.i.bf16 %v476_v61, %v492_v62  ;;  %590 = vmatprep.subr.bf16.mxu0 %v589_v58  ;;  %v593_v8 = vpack.c.bf16 %v202_v0, %v201_v63  ;;  %v477_v12 = vsel %vm91_vm0, 1.0, %v848_v11 }
  0x3d   :  { %v493_v13 = vsel %vm107_vm1, 1.0, %v848_v11  ;;  %615 = vmatprep.subr.bf16.mxu1 %v589_v58  ;;  %vm92_vm2 = vcmp.eq.s32.totalorder %v56_v2, %v914_v7  ;;  %vm108_vm3 = vcmp.eq.s32.totalorder %v72_v3, %v914_v7  ;;  %v57_v16 = vadd.s32 80, %v905_v1 }
  0x3e   :  { %v73_v17 = vadd.s32 208, %v905_v1  ;;  %v595_v18 = vpack.c.bf16 %v186_v10, %v185_v9  ;;  %v652_v19 = vpack.i.bf16 %v477_v12, %v493_v13  ;;  %v597_v20 = vpack.c.bf16 %v204_v15, %v203_v14 }
  0x3f   :  { %592 = vmatpush3.bf16.msra.mxu0 %v591_v4  ;;  %623 = vmatpush3.bf16.msra.mxu1 %v591_v4  ;;  %v478_v23 = vsel %vm92_vm2, 1.0, %v848_v11  ;;  %v494_v24 = vsel %vm108_vm3, 1.0, %v848_v11  ;;  %vm93_vm4 = vcmp.eq.s32.totalorder %v57_v16, %v914_v7  ;;  %v58_v27 = vadd.s32 88, %v905_v1 }
  0x40   :  { %643 = vxpose.xlu0.b32.cont [4/16] %v642_v28, 128  ;;  %594 = vmatprep.subr.bf16.mxu0 %v593_v8  ;;  %vm109_vm5 = vcmp.eq.s32.totalorder %v73_v17, %v914_v7  ;;  %v74_v28 = vadd.s32 216, %v905_v1  ;;  %v599_v29 = vpack.c.bf16 %v188_v22, %v187_v21  ;;  %v654_v30 = vpack.i.bf16 %v478_v23, %v494_v24 }
  0x41   :  { %616 = vmatprep.subr.bf16.mxu1 %v593_v8  ;;  %v601_v31 = vpack.c.bf16 %v206_v26, %v205_v25  ;;  %v479_v34 = vsel %vm93_vm4, 1.0, %v848_v11  ;;  %v495_v35 = vsel %vm109_vm5, 1.0, %v848_v11  ;;  %vm94_vm6 = vcmp.eq.s32.totalorder %v58_v27, %v914_v7 }
  0x42   :  { %vm110_vm7 = vcmp.eq.s32.totalorder %v74_v28, %v914_v7  ;;  %v59_v38 = vadd.s32 96, %v905_v1  ;;  %v75_v39 = vadd.s32 224, %v905_v1  ;;  %v656_v41 = vpack.i.bf16 %v479_v34, %v495_v35 }
  0x43   :  { %596 = vmatpush3.bf16.msra.mxu0 %v595_v18  ;;  %624 = vmatpush3.bf16.msra.mxu1 %v595_v18  ;;  %v605_v42 = vpack.c.bf16 %v208_v37, %v207_v36  ;;  %v480_v45 = vsel %vm94_vm6, 1.0, %v848_v11  ;;  %v496_v46 = vsel %vm110_vm7, 1.0, %v848_v11  ;;  %v60_v49 = vadd.s32 104, %v905_v1 }
  0x44   :  { %645 = vxpose.xlu0.b32.cont [5/16] %v644_v33, 128  ;;  %598 = vmatprep.subr.bf16.mxu0 %v597_v20  ;;  %v190_v33 = vld [vmem:[#allocation5 + $0x58] sm:$0xff]  ;;  %vm95_vm8 = vcmp.eq.s32.totalorder %v59_v38, %v914_v7  ;;  %vm111_vm9 = vcmp.eq.s32.totalorder %v75_v39, %v914_v7  ;;  %v76_v50 = vadd.s32 232, %v905_v1  ;;  %v658_v52 = vpack.i.bf16 %v480_v45, %v496_v46 }
  0x45   :  { %617 = vmatprep.subr.bf16.mxu1 %v597_v20  ;;  %v603_v40 = vpack.c.bf16 %v190_v33, %v189_v32  ;;  %v609_v53 = vpack.c.bf16 %v210_v48, %v209_v47  ;;  %v481_v56 = vsel %vm95_vm8, 1.0, %v848_v11  ;;  %vm96_vm10 = vcmp.eq.s32.totalorder %v60_v49, %v914_v7 }
  0x46   :  { %vm112_vm11 = vcmp.eq.s32.totalorder %v76_v50, %v914_v7  ;;  %v61_v58 = vadd.s32 112, %v905_v1  ;;  %v77_v59 = vadd.s32 240, %v905_v1  ;;  %v611_v60 = vpack.c.bf16 %v194_v55, %v193_v54 }
  0x47   :  { %600 = vmatpush3.bf16.msra.mxu0 %v599_v29  ;;  %625 = vmatpush3.bf16.msra.mxu1 %v599_v29  ;;  %v482_v62 = vsel %vm96_vm10, 1.0, %v848_v11  ;;  %v498_v63 = vsel %vm112_vm11, 1.0, %v848_v11  ;;  %v62_v0 = vadd.s32 120, %v905_v1  ;;  %v78_v2 = vadd.s32 248, %v905_v1 }
  0x48   :  { %647 = vxpose.xlu0.b32.cont [6/16] %v646_v44, 128  ;;  %602 = vmatprep.subr.bf16.mxu0 %v601_v31  ;;  %v192_v44 = vld [vmem:[#allocation5 + $0x68] sm:$0xff]  ;;  %vm97_vm12 = vcmp.eq.s32.totalorder %v61_v58, %v914_v7  ;;  %vm113_vm13 = vcmp.eq.s32.totalorder %v77_v59, %v914_v7  ;;  %v662_v3 = vpack.i.bf16 %v482_v62, %v498_v63  ;;  %vm42_vm0 = vcmp.gt.s32.totalorder %v911_v6, 0 }
  0x49   :  { %618 = vmatprep.subr.bf16.mxu1 %v601_v31  ;;  %v607_v51 = vpack.c.bf16 %v192_v44, %v191_v43  ;;  %v483_v4 = vsel %vm97_vm12, 1.0, %v848_v11  ;;  %vm98_vm14 = vcmp.eq.s32.totalorder %v62_v0, %v914_v7  ;;  %vm114_vm15 = vcmp.eq.s32.totalorder %v78_v2, %v914_v7 }
  0x4a   :  { %v484_v9 = vsel %vm98_vm14, 1.0, %v848_v11  ;;  %v500_v10 = vsel %vm114_vm15, 1.0, %v848_v11  ;;  %v468_v59 = vsel %vm42_vm0, 1.0, %v848_v11 }
  0x4b   :  { %604 = vmatpush3.bf16.msra.mxu0 %v603_v40  ;;  %626 = vmatpush3.bf16.msra.mxu1 %v603_v40  ;;  %v666_v1 = vpack.i.bf16 %v484_v9, %v500_v10  ;;  %45 = vst [vmem:[#allocation8] sm:$0x1] %v468_v59 }
  0x4c   :  { %649 = vxpose.xlu0.b32.cont [7/16] %v648_v57, 128  ;;  %606 = vmatprep.subr.bf16.mxu0 %v605_v42  ;;  %v497_v57 = vsel %vm111_vm9, 1.0, %v848_v11 }
  0x4d   :  { %619 = vmatprep.subr.bf16.mxu1 %v605_v42  ;;  %v660_v61 = vpack.i.bf16 %v481_v56, %v497_v57 }
  0x4f   :  { %608 = vmatpush3.bf16.msra.mxu0 %v607_v51  ;;  %627 = vmatpush3.bf16.msra.mxu1 %v607_v51 }
  0x50   :  { %651 = vxpose.xlu0.b32.cont [8/16] %v650_v5, 128  ;;  %610 = vmatprep.subr.bf16.mxu0 %v609_v53  ;;  %v499_v5 = vsel %vm113_vm13, 1.0, %v848_v11 }
  0x51   :  { %620 = vmatprep.subr.bf16.mxu1 %v609_v53  ;;  %v664_v8 = vpack.i.bf16 %v483_v4, %v499_v5 }
  0x53   :  { %612 = vmatpush3.bf16.msra.mxu0 %v611_v60  ;;  %628 = vmatpush3.bf16.msra.mxu1 %v611_v60 }
  0x54   :  { %653 = vxpose.xlu0.b32.cont [9/16] %v652_v19, 128 }
  0x58   :  { %655 = vxpose.xlu0.b32.cont [10/16] %v654_v30, 128 }
  0x5c   :  { %657 = vxpose.xlu0.b32.cont [11/16] %v656_v41, 128 }
  0x60   :  { %659 = vxpose.xlu0.b32.cont [12/16] %v658_v52, 128 }
  0x64   :  { %661 = vxpose.xlu0.b32.cont [13/16] %v660_v61, 128 }
  0x68   :  { %663 = vxpose.xlu0.b32.cont [14/16] %v662_v3, 128 }
  0x6c   :  { %665 = vxpose.xlu0.b32.cont [15/16] %v664_v8, 128 }
  0x70   :  { %667 = vxpose.xlu0.b32.end [16/16] %v666_v1, 128 }
  0xb4   :  { %v668_v12 = vpop.trf.xlu0 }
  0xb5   :  { %v669_v13 = vunpack.i.l.bf16 %v668_v12  ;;  %v672_v14 = vunpack.i.h.bf16 %v668_v12 }
  0xb7   :  { %339 = vmatprep.mubr.f32.mxu0 %v669_v13 }
  0xb8   :  { %v673_v15 = vpop.trf.xlu0  ;;  %340 = vmatmul.mubr.f32.vlgmr.msra.gmra.mrb[0].mxu0 %v672_v14 }
  0xb9   :  { %v674_v16 = vunpack.i.l.bf16 %v673_v15  ;;  %v677_v17 = vunpack.i.h.bf16 %v673_v15 }
  0xbb   :  { %344 = vmatprep.mubr.f32.mxu0 %v674_v16 }
  0xbc   :  { %v678_v18 = vpop.trf.xlu0  ;;  %345 = vmatmul.mubr.f32.gmra.mrb[2].mxu0 %v677_v17 }
  0xbd   :  { %v679_v7 = vunpack.i.l.bf16 %v678_v18  ;;  %v682_v19 = vunpack.i.h.bf16 %v678_v18 }
  0xbf   :  { %349 = vmatprep.mubr.f32.mxu0 %v679_v7 }
  0xc0   :  { %v683_v20 = vpop.trf.xlu0  ;;  %350 = vmatmul.mubr.f32.gmra.mrb[4].mxu0 %v682_v19 }
  0xc1   :  { %v684_v21 = vunpack.i.l.bf16 %v683_v20  ;;  %v687_v22 = vunpack.i.h.bf16 %v683_v20 }
  0xc3   :  { %354 = vmatprep.mubr.f32.mxu0 %v684_v21 }
  0xc4   :  { %v688_v23 = vpop.trf.xlu0  ;;  %355 = vmatmul.mubr.f32.gmra.mrb[6].mxu0 %v687_v22 }
  0xc5   :  { %v689_v24 = vunpack.i.l.bf16 %v688_v23  ;;  %v692_v25 = vunpack.i.h.bf16 %v688_v23 }
  0xc7   :  { %359 = vmatprep.mubr.f32.mxu0 %v689_v24 }
  0xc8   :  { %v693_v26 = vpop.trf.xlu0  ;;  %360 = vmatmul.mubr.f32.gmra.mrb[8].mxu0 %v692_v25 }
  0xc9   :  { %v694_v27 = vunpack.i.l.bf16 %v693_v26  ;;  %v697_v28 = vunpack.i.h.bf16 %v693_v26 }
  0xcb   :  { %364 = vmatprep.mubr.f32.mxu0 %v694_v27 }
  0xcc   :  { %v698_v29 = vpop.trf.xlu0  ;;  %365 = vmatmul.mubr.f32.gmra.mrb[10].mxu0 %v697_v28 }
  0xcd   :  { %v699_v30 = vunpack.i.l.bf16 %v698_v29  ;;  %v702_v31 = vunpack.i.h.bf16 %v698_v29 }
  0xcf   :  { %369 = vmatprep.mubr.f32.mxu0 %v699_v30 }
  0xd0   :  { %v703_v32 = vpop.trf.xlu0  ;;  %370 = vmatmul.mubr.f32.gmra.mrb[12].mxu0 %v702_v31 }
  0xd1   :  { %v704_v33 = vunpack.i.l.bf16 %v703_v32  ;;  %v707_v34 = vunpack.i.h.bf16 %v703_v32 }
  0xd3   :  { %374 = vmatprep.mubr.f32.mxu0 %v704_v33 }
  0xd4   :  { %v708_v35 = vpop.trf.xlu0  ;;  %375 = vmatmul.mubr.f32.gmra.mrb[14].mxu0 %v707_v34 }
  0xd5   :  { %v709_v36 = vunpack.i.l.bf16 %v708_v35  ;;  %v712_v37 = vunpack.i.h.bf16 %v708_v35 }
  0xd7   :  { %379 = vmatprep.mubr.f32.mxu1 %v709_v36 }
  0xd8   :  { %v713_v38 = vpop.trf.xlu0  ;;  %380 = vmatmul.mubr.f32.vlgmr.msra.gmra.mrb[0].mxu1 %v712_v37 }
  0xd9   :  { %v714_v39 = vunpack.i.l.bf16 %v713_v38  ;;  %v717_v40 = vunpack.i.h.bf16 %v713_v38 }
  0xdb   :  { %384 = vmatprep.mubr.f32.mxu1 %v714_v39 }
  0xdc   :  { %v718_v41 = vpop.trf.xlu0  ;;  %385 = vmatmul.mubr.f32.gmra.mrb[2].mxu1 %v717_v40 }
  0xdd   :  { %v719_v42 = vunpack.i.l.bf16 %v718_v41  ;;  %v722_v43 = vunpack.i.h.bf16 %v718_v41 }
  0xdf   :  { %389 = vmatprep.mubr.f32.mxu1 %v719_v42 }
  0xe0   :  { %v723_v44 = vpop.trf.xlu0  ;;  %390 = vmatmul.mubr.f32.gmra.mrb[4].mxu1 %v722_v43 }
  0xe1   :  { %v724_v45 = vunpack.i.l.bf16 %v723_v44  ;;  %v727_v46 = vunpack.i.h.bf16 %v723_v44 }
  0xe3   :  { %394 = vmatprep.mubr.f32.mxu1 %v724_v45 }
  0xe4   :  { %v728_v47 = vpop.trf.xlu0  ;;  %395 = vmatmul.mubr.f32.gmra.mrb[6].mxu1 %v727_v46 }
  0xe5   :  { %v729_v48 = vunpack.i.l.bf16 %v728_v47  ;;  %v732_v49 = vunpack.i.h.bf16 %v728_v47 }
  0xe7   :  { %399 = vmatprep.mubr.f32.mxu1 %v729_v48 }
  0xe8   :  { %v733_v50 = vpop.trf.xlu0  ;;  %400 = vmatmul.mubr.f32.gmra.mrb[8].mxu1 %v732_v49 }
  0xe9   :  { %v734_v51 = vunpack.i.l.bf16 %v733_v50  ;;  %v737_v52 = vunpack.i.h.bf16 %v733_v50 }
  0xeb   :  { %404 = vmatprep.mubr.f32.mxu1 %v734_v51 }
  0xec   :  { %v738_v53 = vpop.trf.xlu0  ;;  %405 = vmatmul.mubr.f32.gmra.mrb[10].mxu1 %v737_v52 }
  0xed   :  { %v739_v54 = vunpack.i.l.bf16 %v738_v53  ;;  %v742_v55 = vunpack.i.h.bf16 %v738_v53 }
  0xef   :  { %409 = vmatprep.mubr.f32.mxu1 %v739_v54 }
  0xf0   :  { %v743_v56 = vpop.trf.xlu0  ;;  %410 = vmatmul.mubr.f32.gmra.mrb[12].mxu1 %v742_v55 }
  0xf1   :  { %v747_v57 = vunpack.i.h.bf16 %v743_v56  ;;  %v744_v58 = vunpack.i.l.bf16 %v743_v56 }
  0xf3   :  { %414 = vmatprep.mubr.f32.mxu1 %v744_v58 }
  0xf4   :  { %415 = vmatmul.mubr.f32.gmra.mrb[14].mxu1 %v747_v57 }
  0xf5   :  { %803 = shalt.err (!%p800_p6)
}
  0xf6   :  { %s804_s16 = scalar_lea.hbm %s1041_s3, 16 }
  0xf7   :  { %p805_p7 = scmp.ne.s32.totalorder %s1041_s3, %s804_s16  ;;  %p808_p8 = scmp.lt.u32.totalorder %s804_s16, %s1041_s3 }
  0xf9   :  { %p810_p9 = pnand %p808_p8, %p805_p7 }
  0xfb   :  { %813 = shalt.err (!%p810_p9)
}
  0xfc   :  { %457 = dma.vmem_to_hbm [thread:$0]  %s455_s11, 16, %s1041_s3, [#allocation9]  }
  0xfd   :  { %s850_s3 = smov [#allocation7]  }
  0xfe   :  { %s441_s23 = sshll.u32 %s850_s3, 4  ;;  %s442_s23 = int_to_ptr.vmem [resolvable:$true] %s441_s23 }
  0xff   :  { %s814_s24 = scalar_lea.vmem %s442_s23, 2048  ;;  %p819_p11 = scmp.lt.s32.totalorder %s442_s23, %s442_s23 }
 0x100   :  { %p815_p10 = scmp.ne.s32.totalorder %s442_s23, %s814_s24  ;;  %p820_p12 = scmp.lt.s32.totalorder %s814_s24, %s814_s24 }
 0x102   :  { %p821_p13 = por %p820_p12, %p819_p11 }
 0x104   :  { %p822_p0 = pnand %p821_p13, %p815_p10 }
 0x18b   :  { %v533_v6 = vpop.f32.mrb[0].mxu0 }
 0x18c   :  { %v534_v11 = vpop.f32.mrb[1].mxu0 }
 0x18d   :  { %v535_v60 = vadd.f32 %v534_v11, %v533_v6 }
 0x18f   :  { %420 = vst [vmem:[#allocation7] sm:$0xff] %v535_v60  ;;  %v536_v61 = vpop.f32.mrb[2].mxu0 }
 0x190   :  { %v537_v62 = vpop.f32.mrb[3].mxu0 }
 0x191   :  { %v538_v63 = vadd.f32 %v537_v62, %v536_v61 }
 0x193   :  { %421 = vst [vmem:[#allocation7 + $0x8] sm:$0xff] %v538_v63  ;;  %v539_v0 = vpop.f32.mrb[4].mxu0 }
 0x194   :  { %v540_v2 = vpop.f32.mrb[5].mxu0 }
 0x195   :  { %v541_v3 = vadd.f32 %v540_v2, %v539_v0 }
 0x197   :  { %422 = vst [vmem:[#allocation7 + $0x10] sm:$0xff] %v541_v3  ;;  %v542_v4 = vpop.f32.mrb[6].mxu0 }
 0x198   :  { %v543_v5 = vpop.f32.mrb[7].mxu0 }
 0x199   :  { %v544_v8 = vadd.f32 %v543_v5, %v542_v4 }
 0x19b   :  { %423 = vst [vmem:[#allocation7 + $0x18] sm:$0xff] %v544_v8  ;;  %v545_v9 = vpop.f32.mrb[8].mxu0 }
 0x19c   :  { %v546_v10 = vpop.f32.mrb[9].mxu0 }
 0x19d   :  { %v547_v1 = vadd.f32 %v546_v10, %v545_v9 }
 0x19f   :  { %424 = vst [vmem:[#allocation7 + $0x20] sm:$0xff] %v547_v1  ;;  %v548_v12 = vpop.f32.mrb[10].mxu0 }
 0x1a0   :  { %v549_v13 = vpop.f32.mrb[11].mxu0 }
 0x1a1   :  { %v550_v14 = vadd.f32 %v549_v13, %v548_v12 }
 0x1a3   :  { %425 = vst [vmem:[#allocation7 + $0x28] sm:$0xff] %v550_v14  ;;  %v551_v15 = vpop.f32.mrb[12].mxu0 }
 0x1a4   :  { %v552_v16 = vpop.f32.mrb[13].mxu0 }
 0x1a5   :  { %v553_v17 = vadd.f32 %v552_v16, %v551_v15 }
 0x1a7   :  { %426 = vst [vmem:[#allocation7 + $0x30] sm:$0xff] %v553_v17  ;;  %v554_v18 = vpop.f32.mrb[14].mxu0 }
 0x1a8   :  { %v555_v7 = vpop.f32.mrb[15].mxu0 }
 0x1a9   :  { %v556_v19 = vadd.f32 %v555_v7, %v554_v18 }
 0x1ab   :  { %427 = vst [vmem:[#allocation7 + $0x38] sm:$0xff] %v556_v19  ;;  %v557_v20 = vpop.f32.mrb[0].mxu1 }
 0x1ac   :  { %v558_v21 = vpop.f32.mrb[1].mxu1 }
 0x1ad   :  { %v559_v22 = vadd.f32 %v558_v21, %v557_v20 }
 0x1af   :  { %428 = vst [vmem:[#allocation7 + $0x40] sm:$0xff] %v559_v22  ;;  %v560_v23 = vpop.f32.mrb[2].mxu1 }
 0x1b0   :  { %v561_v24 = vpop.f32.mrb[3].mxu1 }
 0x1b1   :  { %v562_v25 = vadd.f32 %v561_v24, %v560_v23 }
 0x1b3   :  { %429 = vst [vmem:[#allocation7 + $0x48] sm:$0xff] %v562_v25  ;;  %v563_v26 = vpop.f32.mrb[4].mxu1 }
 0x1b4   :  { %v564_v27 = vpop.f32.mrb[5].mxu1 }
 0x1b5   :  { %v565_v28 = vadd.f32 %v564_v27, %v563_v26 }
 0x1b7   :  { %430 = vst [vmem:[#allocation7 + $0x50] sm:$0xff] %v565_v28  ;;  %v566_v29 = vpop.f32.mrb[6].mxu1 }
 0x1b8   :  { %v567_v30 = vpop.f32.mrb[7].mxu1 }
 0x1b9   :  { %v568_v31 = vadd.f32 %v567_v30, %v566_v29 }
 0x1bb   :  { %431 = vst [vmem:[#allocation7 + $0x58] sm:$0xff] %v568_v31  ;;  %v569_v32 = vpop.f32.mrb[8].mxu1 }
 0x1bc   :  { %v570_v33 = vpop.f32.mrb[9].mxu1 }
 0x1bd   :  { %v571_v34 = vadd.f32 %v570_v33, %v569_v32 }
 0x1bf   :  { %432 = vst [vmem:[#allocation7 + $0x60] sm:$0xff] %v571_v34  ;;  %v572_v35 = vpop.f32.mrb[10].mxu1 }
 0x1c0   :  { %v573_v36 = vpop.f32.mrb[11].mxu1 }
 0x1c1   :  { %v574_v37 = vadd.f32 %v573_v36, %v572_v35 }
 0x1c3   :  { %433 = vst [vmem:[#allocation7 + $0x68] sm:$0xff] %v574_v37  ;;  %v575_v38 = vpop.f32.mrb[12].mxu1 }
 0x1c4   :  { %v576_v39 = vpop.f32.mrb[13].mxu1 }
 0x1c5   :  { %v577_v40 = vadd.f32 %v576_v39, %v575_v38 }
 0x1c7   :  { %434 = vst [vmem:[#allocation7 + $0x70] sm:$0xff] %v577_v40  ;;  %v578_v41 = vpop.f32.mrb[14].mxu1 }
 0x1c8   :  { %v579_v42 = vpop.f32.mrb[15].mxu1 }
 0x1c9   :  { %v580_v43 = vadd.f32 %v579_v42, %v578_v41 }
 0x1cb   :  { %435 = vst [vmem:[#allocation7 + $0x78] sm:$0xff] %v580_v43 }
 0x1cc   :  { %825 = shalt.err (!%p822_p0)
}
 0x1cd   :  { %s826_s27 = scalar_lea.hbm %s1040_s2, 2048 }
 0x1ce   :  { %p827_p1 = scmp.ne.s32.totalorder %s1040_s2, %s826_s27  ;;  %p830_p2 = scmp.lt.u32.totalorder %s826_s27, %s1040_s2 }
 0x1d0   :  { %p832_p3 = pnand %p830_p2, %p827_p1 }
 0x1d2   :  { %835 = shalt.err (!%p832_p3)
}
 0x1d3   :  { %447 = dma.vmem_to_hbm [thread:$0]  %s442_s23, 2048, %s1040_s2, [#allocation4], %s846_s0, %s846_s0, %s847_s8  }
 0x1d4   :  { %840 = dma.done.wait [#allocation4], 2048  }
 0x1d5   :  { %841 = vsyncadd [#allocation4], 4294965248 }
 0x1d6   :  { %842 = dma.done.wait [#allocation9], 16  }
 0x1d7   :  { %843 = vsyncadd [#allocation9], 4294967280 }
 0x1d8   :  { %464 = vsyncpa [#allocation3], 1 }
 0x1d9   :  { %465 = vsyncpa [#allocation6], 1 }
 0x1da   :  { %466 = vsyncpa [#allocation4], 1 }
 0x1db   :  { %467 = vsyncpa [#allocation9], 1 }

</bundles_post_ra>
